<compile_context>
chip_gen: v6e
topology: v6e:2x2x1
jax: 0.10.0
libtpu: 0.0.40
codegen_flags: <defaults>
</compile_context>

<pallas_src>
import functools

import jax
import jax.numpy as jnp
from jax.experimental import pallas as pl
from jax.experimental.pallas import tpu as pltpu


def _round_up(x, m):
    return ((x + m - 1) // m) * m


def _mlconv_kernel(x_ref, halo_ref, w1_ref, b1_ref, w2_ref, b2_ref, o_ref, *,
                   K, pad, tT, T, Lh8, halo_left, use_halo, im2col1, im2col2):
    # x_ref   : (tT, Cin)          main time tile (auto-pipelined)
    # halo_ref: (halo_rows, Cin)   left (2*pad) + right (Lh8 - tT) halo rows (auto-pipelined)
    # w1_ref  : (K, Cin, H)   b1_ref: (1, H)   (f32 bias)
    # w2_ref  : (K, H, Cin)   b2_ref: (1, Cin)
    # o_ref   : (tT, Cin)
    j = pl.program_id(1)
    Cin = x_ref.shape[1]
    H = w1_ref.shape[2]

    xm = x_ref[...]                                     # (tT, Cin), compute dtype
    if use_halo:
        hal = halo_ref[...]                             # (halo_left + halo_right, Cin)
        hl = hal[:halo_left, :]                         # global [j*tT - 2*pad, j*tT)
        hr = hal[halo_left:, :]                         # global [(j+1)*tT, ...)
        # window row r  <->  global input position  j*tT - 2*pad + r   (zeros outside [0,T))
        xw = jnp.concatenate([hl, xm, hr], axis=0)      # (Lh8 + 2*pad, Cin)
    else:                                               # kernel_size == 1: pointwise FFN
        xw = xm

    # ---- conv1: 8-aligned M dim (Lh8 rows), f32 accumulation -----------------
    if im2col1:
        xc = jnp.concatenate([xw[tap:tap + Lh8, :] for tap in range(K)], axis=1)
        z = jnp.dot(xc, w1_ref[...].reshape(K * Cin, H),
                    preferred_element_type=jnp.float32)
    else:
        z = jnp.dot(xw[0:Lh8, :], w1_ref[0], preferred_element_type=jnp.float32)
        for tap in range(1, K):
            z = z + jnp.dot(xw[tap:tap + Lh8, :], w1_ref[tap],
                            preferred_element_type=jnp.float32)

    # ---- fused epilogue: bias + ReLU + conv2 zero-padding mask ---------------
    # hidden row i sits at global position s = j*tT - pad + i; positions outside
    # [0, T) are conv2's zero padding of the hidden sequence.
    r = jax.lax.broadcasted_iota(jnp.int32, (Lh8, 1), 0)
    s_hid = j * tT - pad + r
    valid = (s_hid >= 0) & (s_hid < T)
    h = jnp.where(valid, jnp.maximum(z + b1_ref[...], 0.0), 0.0)
    # Cast hidden to the compute dtype (bf16 hidden when bf16 in: deliberate tradeoff).
    h = h.astype(xm.dtype)
    # (dropout: identity at inference)
    # TODO(synk): training-mode dropout (RNG mask) not implemented.

    # ---- conv2: M dim = tT (8-aligned), reads the haloed hidden directly -----
    if im2col2:
        hc = jnp.concatenate([h[tap:tap + tT, :] for tap in range(K)], axis=1)
        y = jnp.dot(hc, w2_ref[...].reshape(K * H, Cin),
                    preferred_element_type=jnp.float32)
    else:
        y = jnp.dot(h[0:tT, :], w2_ref[0], preferred_element_type=jnp.float32)
        for tap in range(1, K):
            y = y + jnp.dot(h[tap:tap + tT, :], w2_ref[tap],
                            preferred_element_type=jnp.float32)
    y = y + b2_ref[...]

    o_ref[...] = y.astype(o_ref.dtype)


def _pick_time_tile(T, target):
    """Largest multiple-of-8 divisor of T that is <= target (else T itself)."""
    if T <= target:
        return T
    for cand in range(min(int(target), T), 7, -1):
        if T % cand == 0 and cand % 8 == 0:
            return cand
    return T


def _vmem_capacity_bytes():
    try:
        cap = int(pltpu.get_tpu_info().vmem_capacity_bytes)
        if cap > 0:
            return cap
    except Exception:
        pass
    return 64 * 1024 * 1024          # conservative (v7x-sized) fallback


def _auto_time_tile(T, B, Cin, H, K, itemsize, vmem_limit):
    """Generation-aware tile: biggest tT whose per-step working set fits the budget."""
    budget = int(vmem_limit * 0.6)
    fixed = 2 * (2 * K * Cin * H) * itemsize + 8 * (H + Cin)     # dbl-buffered weights + biases
    per_row = (4 * Cin * itemsize          # in + out blocks (double-buffered)
               + Cin * itemsize            # stitched window
               + H * (4 + itemsize)        # f32 accumulator + hidden tile
               + Cin * 4)                  # f32 conv2 accumulator
    tgt = (budget - fixed) // max(per_row, 1)
    tgt = max(8, min(int(tgt), 4096))
    tgt = (tgt // 8) * 8
    if B == 1 and T >= 16:
        # keep >= 2 parallel grid steps so both v7x TensorCores get work
        tgt = min(tgt, max(8, ((T // 2) // 8) * 8))
    return max(8, tgt)


def multi_layered_conv1d(x, w1, b1, w2, b2, kernel_size, *,
                         time_tile=None, compute_dtype=None,
                         vmem_limit_bytes=None, single_buffer_weights=False):
    """x: (B, T, Cin) channels-last.  w1: (H, Cin, K), w2: (Cin, H, K) (torch layout)."""
    B, T, Cin = x.shape
    H = w1.shape[0]
    K = int(kernel_size)
    assert K % 2 == 1, "only odd kernel_size matches torch 'same'-style padding here"
    assert w1.shape == (H, Cin, K) and w2.shape == (Cin, H, K)
    pad = (K - 1) // 2

    cdt = jnp.dtype(compute_dtype) if compute_dtype is not None else jnp.dtype(x.dtype)
    itemsize = jnp.dtype(cdt).itemsize

    # Always set a generation-aware VMEM limit (default scoped limit is too small).
    if vmem_limit_bytes is None:
        vmem_limit_bytes = min(_vmem_capacity_bytes() * 3 // 4, 100 * 1024 * 1024)
    vmem_limit_bytes = int(vmem_limit_bytes)

    if time_tile is None:
        time_tile = _auto_time_tile(T, B, Cin, H, K, itemsize, vmem_limit_bytes)
    tT = _pick_time_tile(T, time_tile)
    n_t = T // tT

    use_halo = pad > 0
    Lh = tT + 2 * pad                         # hidden rows actually consumed by conv2
    Lh8 = _round_up(Lh, 8) if use_halo else tT  # 8-aligned conv1 M dim
    halo_left = 2 * pad
    halo_right = (Lh8 - tT) if use_halo else 0
    halo_rows = (halo_left + halo_right) if use_halo else 8  # dummy (ignored) when pad == 0

    x_c = x.astype(cdt)

    # Tiny per-tile halo slab (auto-pipelined second input); NO full-activation pad/copy.
    if use_halo:
        starts = jnp.arange(n_t, dtype=jnp.int32) * tT
        left_idx = starts[:, None] + (jnp.arange(halo_left, dtype=jnp.int32) - halo_left)[None, :]
        right_idx = (starts + tT)[:, None] + jnp.arange(halo_right, dtype=jnp.int32)[None, :]
        idx = jnp.concatenate([left_idx, right_idx], axis=1)          # (n_t, halo_rows)
        in_range = (idx >= 0) & (idx < T)
        gathered = jnp.take(x_c, jnp.clip(idx, 0, T - 1), axis=1)     # (B, n_t, halo_rows, Cin)
        halos = jnp.where(in_range[None, :, :, None], gathered,
                          jnp.zeros((), cdt))
    else:
        halos = jnp.zeros((B, n_t, halo_rows, Cin), cdt)

    # Repack weights (out, in, k) -> (k, in, out); biases kept in f32.
    w1_k = jnp.transpose(w1, (2, 1, 0)).astype(cdt)          # (K, Cin, H)
    w2_k = jnp.transpose(w2, (2, 1, 0)).astype(cdt)          # (K, H, Cin)
    b1_r = b1.reshape(1, H).astype(jnp.float32)
    b2_r = b2.reshape(1, Cin).astype(jnp.float32)

    # im2col (one deep matmul per conv) only when the contraction dims are lane-aligned.
    im2col1 = (Cin % 128 == 0)
    im2col2 = (H % 128 == 0)

    kernel = functools.partial(
        _mlconv_kernel, K=K, pad=pad, tT=tT, T=T, Lh8=Lh8,
        halo_left=halo_left, use_halo=use_halo, im2col1=im2col1, im2col2=im2col2)

    flops = 4 * B * T * K * Cin * H
    bytes_accessed = (B * T * Cin * itemsize
                      + B * n_t * halo_rows * Cin * itemsize
                      + 2 * K * Cin * H * itemsize
                      + 4 * (H + Cin)
                      + B * T * Cin * jnp.dtype(x.dtype).itemsize)
    cost = pl.CostEstimate(flops=int(flops), transcendentals=0,
                           bytes_accessed=int(bytes_accessed))

    def _weight_spec(shape):
        # Constant index_map -> weights stay resident across the whole grid.
        if single_buffer_weights:
            # Halves weight VMEM residency (useful on v7x's 64 MiB VMEM at prod sizes).
            return pl.BlockSpec(shape, lambda b, j: (0,) * len(shape),
                                pipeline_mode=pl.Buffered(1))
        return pl.BlockSpec(shape, lambda b, j: (0,) * len(shape))

    return pl.pallas_call(
        kernel,
        out_shape=jax.ShapeDtypeStruct((B, T, Cin), x.dtype),
        grid=(B, n_t),
        in_specs=[
            pl.BlockSpec((None, tT, Cin), lambda b, j: (b, j, 0)),           # main tile
            pl.BlockSpec((None, None, halo_rows, Cin), lambda b, j: (b, j, 0, 0)),  # halo
            _weight_spec((K, Cin, H)),
            _weight_spec((1, H)),
            _weight_spec((K, H, Cin)),
            _weight_spec((1, Cin)),
        ],
        out_specs=pl.BlockSpec((None, tT, Cin), lambda b, j: (b, j, 0)),
        compiler_params=pltpu.CompilerParams(
            dimension_semantics=("parallel", "parallel"),
            vmem_limit_bytes=vmem_limit_bytes),
        cost_estimate=cost,
    )(x_c, halos, w1_k, b1_r, w2_k, b2_r)


def _reference(x, w1, b1, w2, b2, kernel_size):
    """Pure-JAX reference matching torch semantics (NCL conv, same padding)."""
    pad = (kernel_size - 1) // 2
    x_ncl = jnp.transpose(x, (0, 2, 1))  # (B, Cin, T)
    h = jax.lax.conv_general_dilated(
        x_ncl, w1, window_strides=(1,), padding=[(pad, pad)],
        dimension_numbers=("NCH", "OIH", "NCH"),
        precision=jax.lax.Precision.HIGHEST) + b1[None, :, None]
    h = jnp.maximum(h, 0.0)
    y = jax.lax.conv_general_dilated(
        h, w2, window_strides=(1,), padding=[(pad, pad)],
        dimension_numbers=("NCH", "OIH", "NCH"),
        precision=jax.lax.Precision.HIGHEST) + b2[None, :, None]
    return jnp.transpose(y, (0, 2, 1))  # (B, T, Cin)


if __name__ == "__main__":
    # MultiLayeredConv1d(in_chans=4, hidden_chans=32, kernel_size=3, dropout_rate=0.1)
    B, T, in_chans, hidden_chans, K = 2, 16, 4, 32, 3

    key = jax.random.PRNGKey(0)
    k_x, k_w1, k_b1, k_w2, k_b2 = jax.random.split(key, 5)

    x = jax.random.normal(k_x, (B, T, in_chans), jnp.float32)
    # torch Conv1d weight layout: (out_channels, in_channels, kernel_size)
    w1 = 0.1 * jax.random.normal(k_w1, (hidden_chans, in_chans, K), jnp.float32)
    b1 = 0.1 * jax.random.normal(k_b1, (hidden_chans,), jnp.float32)
    w2 = 0.1 * jax.random.normal(k_w2, (in_chans, hidden_chans, K), jnp.float32)
    b2 = 0.1 * jax.random.normal(k_b2, (in_chans,), jnp.float32)

    ref = _reference(x, w1, b1, w2, b2, K)

    # time_tile=8 -> grid (B, 2): exercises the cross-tile halo exchange path.
    out_tiled = jax.block_until_ready(
        multi_layered_conv1d(x, w1, b1, w2, b2, K, time_tile=8))
    assert out_tiled.shape == (B, T, in_chans)
    assert jnp.allclose(out_tiled, ref, atol=5e-3, rtol=5e-3), "tiled path mismatch vs reference"

    # Auto (generation-aware) tiling path.
    out_auto = jax.block_until_ready(
        multi_layered_conv1d(x, w1, b1, w2, b2, K))
    assert jnp.allclose(out_auto, ref, atol=5e-3, rtol=5e-3), "auto path mismatch vs reference"

    print("KERNEL_OK")
</pallas_src>

<mosaic_0001>
module attributes {stable_mosaic.version = 11 : i64} {
  func.func @_mlconv_kernel(%arg0: i32, %arg1: i32, %arg2: memref<1x8x4xf32, #tpu.memory_space<vmem>>, %arg3: memref<1x1x10x4xf32, #tpu.memory_space<vmem>>, %arg4: memref<3x4x32xf32, #tpu.memory_space<vmem>>, %arg5: memref<1x32xf32, #tpu.memory_space<vmem>>, %arg6: memref<3x32x4xf32, #tpu.memory_space<vmem>>, %arg7: memref<1x4xf32, #tpu.memory_space<vmem>>, %arg8: memref<1x8x4xf32, #tpu.memory_space<vmem>>) attributes {dimension_semantics = [#tpu.dimension_semantics<parallel>, #tpu.dimension_semantics<parallel>], iteration_bounds = array<i64: 2, 2>, scalar_prefetch = 0 : i64, scratch_operands = 0 : i64, tpu.core_type = #tpu.core_type<tc>, window_params = [{transform_indices = @transform_0, window_bounds = array<i64: 1, 8, 4>}, {transform_indices = @transform_1, window_bounds = array<i64: 1, 1, 10, 4>}, {pipeline_mode = #tpu.pipeline_mode<synchronous>, transform_indices = @transform_2, window_bounds = array<i64: 3, 4, 32>}, {pipeline_mode = #tpu.pipeline_mode<synchronous>, transform_indices = @transform_3, window_bounds = array<i64: 1, 32>}, {pipeline_mode = #tpu.pipeline_mode<synchronous>, transform_indices = @transform_4, window_bounds = array<i64: 3, 32, 4>}, {pipeline_mode = #tpu.pipeline_mode<synchronous>, transform_indices = @transform_5, window_bounds = array<i64: 1, 4>}, {transform_indices = @transform_6, window_bounds = array<i64: 1, 8, 4>}]} {
    %c0 = arith.constant 0 : index
    %c0_0 = arith.constant 0 : index
    %c0_1 = arith.constant 0 : index
    %0 = vector.load %arg2[%c0, %c0_0, %c0_1] : memref<1x8x4xf32, #tpu.memory_space<vmem>>, vector<1x8x4xf32>
    %1 = vector.shape_cast %0 : vector<1x8x4xf32> to vector<8x4xf32>
    %c0_2 = arith.constant 0 : index
    %c0_3 = arith.constant 0 : index
    %c0_4 = arith.constant 0 : index
    %c0_5 = arith.constant 0 : index
    %2 = vector.load %arg3[%c0_2, %c0_3, %c0_4, %c0_5] : memref<1x1x10x4xf32, #tpu.memory_space<vmem>>, vector<1x1x10x4xf32>
    %3 = vector.shape_cast %2 : vector<1x1x10x4xf32> to vector<10x4xf32>
    %4 = vector.extract_strided_slice %3 {offsets = [0, 0], sizes = [2, 4], strides = [1, 1]} : vector<10x4xf32> to vector<2x4xf32>
    %5 = vector.extract_strided_slice %3 {offsets = [2, 0], sizes = [8, 4], strides = [1, 1]} : vector<10x4xf32> to vector<8x4xf32>
    %6 = tpu.concatenate %4, %1, %5 in 0 : vector<2x4xf32>, vector<8x4xf32>, vector<8x4xf32> -> vector<18x4xf32>
    %7 = vector.extract_strided_slice %6 {offsets = [0, 0], sizes = [16, 4], strides = [1, 1]} : vector<18x4xf32> to vector<16x4xf32>
    %c0_6 = arith.constant 0 : index
    %c0_7 = arith.constant 0 : index
    %c0_8 = arith.constant 0 : index
    %8 = vector.load %arg4[%c0_6, %c0_7, %c0_8] : memref<3x4x32xf32, #tpu.memory_space<vmem>>, vector<1x4x32xf32>
    %9 = vector.shape_cast %8 : vector<1x4x32xf32> to vector<4x32xf32>
    %cst = arith.constant dense<0.000000e+00> : vector<16x32xf32>
    %10 = tpu.matmul %7, %9, %cst {dimension_numbers = #tpu.dot_dimension_numbers<[1], [0], [0], [1], [0, 0, 1, 1], [], []>} : vector<16x4xf32>, vector<4x32xf32>, vector<16x32xf32> -> vector<16x32xf32>
    %11 = vector.extract_strided_slice %6 {offsets = [1, 0], sizes = [16, 4], strides = [1, 1]} : vector<18x4xf32> to vector<16x4xf32>
    %c1 = arith.constant 1 : index
    %c0_9 = arith.constant 0 : index
    %c0_10 = arith.constant 0 : index
    %12 = vector.load %arg4[%c1, %c0_9, %c0_10] : memref<3x4x32xf32, #tpu.memory_space<vmem>>, vector<1x4x32xf32>
    %13 = vector.shape_cast %12 : vector<1x4x32xf32> to vector<4x32xf32>
    %cst_11 = arith.constant dense<0.000000e+00> : vector<16x32xf32>
    %14 = tpu.matmul %11, %13, %cst_11 {dimension_numbers = #tpu.dot_dimension_numbers<[1], [0], [0], [1], [0, 0, 1, 1], [], []>} : vector<16x4xf32>, vector<4x32xf32>, vector<16x32xf32> -> vector<16x32xf32>
    %15 = arith.addf %10, %14 : vector<16x32xf32>
    %16 = vector.extract_strided_slice %6 {offsets = [2, 0], sizes = [16, 4], strides = [1, 1]} : vector<18x4xf32> to vector<16x4xf32>
    %c2 = arith.constant 2 : index
    %c0_12 = arith.constant 0 : index
    %c0_13 = arith.constant 0 : index
    %17 = vector.load %arg4[%c2, %c0_12, %c0_13] : memref<3x4x32xf32, #tpu.memory_space<vmem>>, vector<1x4x32xf32>
    %18 = vector.shape_cast %17 : vector<1x4x32xf32> to vector<4x32xf32>
    %cst_14 = arith.constant dense<0.000000e+00> : vector<16x32xf32>
    %19 = tpu.matmul %16, %18, %cst_14 {dimension_numbers = #tpu.dot_dimension_numbers<[1], [0], [0], [1], [0, 0, 1, 1], [], []>} : vector<16x4xf32>, vector<4x32xf32>, vector<16x32xf32> -> vector<16x32xf32>
    %20 = arith.addf %15, %19 : vector<16x32xf32>
    %21 = tpu.iota {dimensions = array<i32: 0>} : vector<16x1xi32>
    %c8_i32 = arith.constant 8 : i32
    %22 = arith.muli %arg1, %c8_i32 : i32
    %c1_i32 = arith.constant 1 : i32
    %23 = arith.subi %22, %c1_i32 : i32
    %24 = vector.broadcast %23 : i32 to vector<16x1xi32>
    %25 = arith.addi %24, %21 : vector<16x1xi32>
    %c0_i32 = arith.constant 0 : i32
    %26 = vector.broadcast %c0_i32 : i32 to vector<16x1xi32>
    %27 = arith.cmpi sge, %25, %26 : vector<16x1xi32>
    %c16_i32 = arith.constant 16 : i32
    %28 = vector.broadcast %c16_i32 : i32 to vector<16x1xi32>
    %29 = arith.cmpi slt, %25, %28 : vector<16x1xi32>
    %30 = arith.andi %27, %29 : vector<16x1xi1>
    %c0_15 = arith.constant 0 : index
    %c0_16 = arith.constant 0 : index
    %31 = vector.load %arg5[%c0_15, %c0_16] : memref<1x32xf32, #tpu.memory_space<vmem>>, vector<1x32xf32>
    %32 = vector.broadcast %31 : vector<1x32xf32> to vector<16x32xf32>
    %33 = arith.addf %20, %32 : vector<16x32xf32>
    %cst_17 = arith.constant 0.000000e+00 : f32
    %34 = vector.broadcast %cst_17 : f32 to vector<16x32xf32>
    %35 = arith.maximumf %33, %34 : vector<16x32xf32>
    %cst_18 = arith.constant 0.000000e+00 : f32
    %36 = vector.shape_cast %30 : vector<16x1xi1> to vector<16x1xi1>
    %37 = vector.broadcast %36 : vector<16x1xi1> to vector<16x32xi1>
    %38 = vector.broadcast %cst_18 : f32 to vector<16x32xf32>
    %39 = arith.select %37, %35, %38 : vector<16x32xi1>, vector<16x32xf32>
    %40 = vector.extract_strided_slice %39 {offsets = [0, 0], sizes = [8, 32], strides = [1, 1]} : vector<16x32xf32> to vector<8x32xf32>
    %c0_19 = arith.constant 0 : index
    %c0_20 = arith.constant 0 : index
    %c0_21 = arith.constant 0 : index
    %41 = vector.load %arg6[%c0_19, %c0_20, %c0_21] : memref<3x32x4xf32, #tpu.memory_space<vmem>>, vector<1x32x4xf32>
    %42 = vector.shape_cast %41 : vector<1x32x4xf32> to vector<32x4xf32>
    %cst_22 = arith.constant dense<0.000000e+00> : vector<8x4xf32>
    %43 = tpu.matmul %40, %42, %cst_22 {dimension_numbers = #tpu.dot_dimension_numbers<[1], [0], [0], [1], [0, 0, 1, 1], [], []>} : vector<8x32xf32>, vector<32x4xf32>, vector<8x4xf32> -> vector<8x4xf32>
    %44 = vector.extract_strided_slice %39 {offsets = [1, 0], sizes = [8, 32], strides = [1, 1]} : vector<16x32xf32> to vector<8x32xf32>
    %c1_23 = arith.constant 1 : index
    %c0_24 = arith.constant 0 : index
    %c0_25 = arith.constant 0 : index
    %45 = vector.load %arg6[%c1_23, %c0_24, %c0_25] : memref<3x32x4xf32, #tpu.memory_space<vmem>>, vector<1x32x4xf32>
    %46 = vector.shape_cast %45 : vector<1x32x4xf32> to vector<32x4xf32>
    %cst_26 = arith.constant dense<0.000000e+00> : vector<8x4xf32>
    %47 = tpu.matmul %44, %46, %cst_26 {dimension_numbers = #tpu.dot_dimension_numbers<[1], [0], [0], [1], [0, 0, 1, 1], [], []>} : vector<8x32xf32>, vector<32x4xf32>, vector<8x4xf32> -> vector<8x4xf32>
    %48 = arith.addf %43, %47 : vector<8x4xf32>
    %49 = vector.extract_strided_slice %39 {offsets = [2, 0], sizes = [8, 32], strides = [1, 1]} : vector<16x32xf32> to vector<8x32xf32>
    %c2_27 = arith.constant 2 : index
    %c0_28 = arith.constant 0 : index
    %c0_29 = arith.constant 0 : index
    %50 = vector.load %arg6[%c2_27, %c0_28, %c0_29] : memref<3x32x4xf32, #tpu.memory_space<vmem>>, vector<1x32x4xf32>
    %51 = vector.shape_cast %50 : vector<1x32x4xf32> to vector<32x4xf32>
    %cst_30 = arith.constant dense<0.000000e+00> : vector<8x4xf32>
    %52 = tpu.matmul %49, %51, %cst_30 {dimension_numbers = #tpu.dot_dimension_numbers<[1], [0], [0], [1], [0, 0, 1, 1], [], []>} : vector<8x32xf32>, vector<32x4xf32>, vector<8x4xf32> -> vector<8x4xf32>
    %53 = arith.addf %48, %52 : vector<8x4xf32>
    %c0_31 = arith.constant 0 : index
    %c0_32 = arith.constant 0 : index
    %54 = vector.load %arg7[%c0_31, %c0_32] : memref<1x4xf32, #tpu.memory_space<vmem>>, vector<1x4xf32>
    %55 = vector.broadcast %54 : vector<1x4xf32> to vector<8x4xf32>
    %56 = arith.addf %53, %55 : vector<8x4xf32>
    %c0_33 = arith.constant 0 : index
    %c0_34 = arith.constant 0 : index
    %c0_35 = arith.constant 0 : index
    %57 = vector.load %arg8[%c0_33, %c0_34, %c0_35] : memref<1x8x4xf32, #tpu.memory_space<vmem>>, vector<1x8x4xf32>
    %58 = vector.shape_cast %57 : vector<1x8x4xf32> to vector<8x4xf32>
    %59 = vector.shape_cast %56 : vector<8x4xf32> to vector<1x8x4xf32>
    tpu.vector_store %arg8[%c0_33, %c0_34, %c0_35], %59 {strides = array<i32>} : memref<1x8x4xf32, #tpu.memory_space<vmem>>, vector<1x8x4xf32>,
    return
  }
  func.func @transform_0(%arg0: i32, %arg1: i32) -> (i32, i32, i32) {
    %c0_i32 = arith.constant 0 : i32
    %c0_i32_0 = arith.constant 0 : i32
    return %arg0, %arg1, %c0_i32 : i32, i32, i32
  }
  func.func @transform_1(%arg0: i32, %arg1: i32) -> (i32, i32, i32, i32) {
    %c0_i32 = arith.constant 0 : i32
    %c0_i32_0 = arith.constant 0 : i32
    %c0_i32_1 = arith.constant 0 : i32
    return %arg0, %arg1, %c0_i32, %c0_i32_0 : i32, i32, i32, i32
  }
  func.func @transform_2(%arg0: i32, %arg1: i32) -> (i32, i32, i32) {
    %c0_i32 = arith.constant 0 : i32
    %c0_i32_0 = arith.constant 0 : i32
    %c0_i32_1 = arith.constant 0 : i32
    %c0_i32_2 = arith.constant 0 : i32
    return %c0_i32, %c0_i32_0, %c0_i32_1 : i32, i32, i32
  }
  func.func @transform_3(%arg0: i32, %arg1: i32) -> (i32, i32) {
    %c0_i32 = arith.constant 0 : i32
    %c0_i32_0 = arith.constant 0 : i32
    %c0_i32_1 = arith.constant 0 : i32
    return %c0_i32, %c0_i32_0 : i32, i32
  }
  func.func @transform_4(%arg0: i32, %arg1: i32) -> (i32, i32, i32) {
    %c0_i32 = arith.constant 0 : i32
    %c0_i32_0 = arith.constant 0 : i32
    %c0_i32_1 = arith.constant 0 : i32
    %c0_i32_2 = arith.constant 0 : i32
    return %c0_i32, %c0_i32_0, %c0_i32_1 : i32, i32, i32
  }
  func.func @transform_5(%arg0: i32, %arg1: i32) -> (i32, i32) {
    %c0_i32 = arith.constant 0 : i32
    %c0_i32_0 = arith.constant 0 : i32
    %c0_i32_1 = arith.constant 0 : i32
    return %c0_i32, %c0_i32_0 : i32, i32
  }
  func.func @transform_6(%arg0: i32, %arg1: i32) -> (i32, i32, i32) {
    %c0_i32 = arith.constant 0 : i32
    %c0_i32_0 = arith.constant 0 : i32
    return %arg0, %arg1, %c0_i32 : i32, i32, i32
  }
}

</mosaic_0001>

<bundles_post_ra>
// kernel: tpu_custom_call.1
= control target key start
LH: loop header
LB: loop body
LE: loop exit
PB: predicated region body
PF: predicated region fallthrough
CT: control target
= control target key end

     0   :  { %s1214_s21 = smov 0   ;;  %s1216_s22 = smov 0   ;;  %s1371_s0 = inlined_call_operand.vmem [shape: f32[2,16,4], index: 0, kind: input, shape index: {}]   ;;  %s1372_s1 = inlined_call_operand.vmem [shape: f32[2,2,10,4], index: 1, kind: input, shape index: {}]   ;;  %s1373_s2 = inlined_call_operand.vmem [shape: f32[3,4,32], index: 2, kind: input, shape index: {}]   ;;  %s1374_s3 = inlined_call_operand.vmem [shape: f32[1,32], index: 3, kind: input, shape index: {}]   ;;  %s1375_s4 = inlined_call_operand.vmem [shape: f32[3,32,4], index: 4, kind: input, shape index: {}]   ;;  %s1376_s5 = inlined_call_operand.vmem [shape: f32[1,4], index: 5, kind: input, shape index: {}]   ;;  %s1377_s6 = inlined_call_operand.vmem [shape: f32[2,16,4], index: 6, kind: output, shape index: {}]  }
   0x1   :  { %s1218_s23 = smov 0   ;;  %s1220_s24 = smov 0  }
   0x2   :  { %s1222_s25 = smov 0  }
   0x3 LB: > { %s25_s26 = sadd.s32 1, %s1167_s23  ;;  %s28_s27 = sadd.s32 1, %s1171_s24  ;;  %s1175_s25 = sphi %s1222_s25, %s16_s25   ;;  %s1171_s24 = sphi %s1220_s24, %s1381_s24   ;;  %s1167_s23 = sphi %s1218_s23, %s1380_s23   ;;  %s1163_s22 = sphi %s1216_s22, %s1379_s22   ;;  %s1159_s21 = sphi %s1214_s21, %s1378_s21  }
   0x4   : > { %p26_p0 = scmp.ge.s32.totalorder %s25_s26, 2  ;;  %p987_p1 = scmp.ge.s32.totalorder %s1175_s25, 1 }
   0x5   : > { %p247_p2 = scmp.lt.s32.totalorder %s1175_s25, 5 }
   0x6   : > { %s1383_s26 = smov (%p26_p0, %s25_s26), 0  ;;  %s1385_s27 = smov (!%p26_p0, %s28_s27), %s1171_s24 }
   0x7   : > { %p248_p3 = pnand %p987_p1, %p247_p2  ;;  %p30_p4 = scmp.ge.s32.totalorder %s1385_s27, 2 }
   0x8   : > { %p292_p5 = scmp.lt.s32.totalorder (!%p248_p3), %s1163_s22, 1  ;;  %p294_p6 = scmp.lt.s32.totalorder (!%p248_p3), %s1159_s21, 1 }
   0x9   : > { %s1387_s27 = smov (%p30_p4, %s1385_s27), 0  ;;  %251 = sbr.rel (%p248_p3) target bundleno = 443 (0x1bb), region = 44 }
   0xe   : > { %v995_v0 = vld [vmem:[%s1373_s2 + $0x4] sm:$0xf]  ;;  %vm343_vm0 = vcmask 1043456   ;;  %v326_v1 = vld [vmem:[%s1373_s2] sm:$0xf]  ;;  %s1389_s22 = smov (!%p292_p5, %s1163_s22), 1  ;;  %v596_v28 = vlaneseq }
   0xf   : > { %1047 = vmatprep.subr.msk.mxu0 %vm343_vm0, %v995_v0  ;;  %1052 = vmatprep.subr.msk.mxu1 %vm343_vm0, %v326_v1  ;;  %v1002_v2 = vld [vmem:[%s1373_s2 + $0x8] sm:$0xf]  ;;  %s295_s10 = scalar_select %p294_p6, %s1159_s21, 1  ;;  %vm323_vm1 = vcmask 1041408   ;;  %vm338_vm2 = vcmask 31744   ;;  %vm332_vm3 = vcmask 1046528  }
  0x10   : > { %1048 = vmatpush3.msk.msra.mxu0 %vm343_vm0, %v995_v0  ;;  %1053 = vmatpush3.msk.msra.mxu1 %vm343_vm0, %v326_v1  ;;  %s988_s11 = sshll.u32 %s1389_s22, 1  ;;  %s991_s12 = sshll.u32 %s1389_s22, 2  ;;  %vm506_vm4 = vcmask 1045504   ;;  %v1177_v19 = vmov 0.0   ;;  %v630_v20 = vld [vmem:[%s1375_s4 + $0x18] sm:$0xff]  ;;  %v629_v22 = vld [vmem:[%s1375_s4 + $0x10] sm:$0xff] }
  0x11   : > { %1057 = vmatprep.subr.msk.mxu0 %vm343_vm0, %v1002_v2  ;;  %s1262_s13 = sadd.s32 %s988_s11, %s295_s10  ;;  %s990_s14 = sshll.u32 %s295_s10, 1  ;;  %1062 = vmatprep.subr.mxu1 %v1177_v19  ;;  %v1012_v21 = vld [vmem:[%s1375_s4 + $0x38] sm:$0xff]  ;;  %v1011_v23 = vld [vmem:[%s1375_s4 + $0x30] sm:$0xff]  ;;  %v628_v24 = vld [vmem:[%s1375_s4 + $0x8] sm:$0xff]  ;;  %vm1178_vm5 = vmmov 0   ;;  %v597_v29 = vshrl.u32 %v596_v28, 7 }
  0x12   : > { %s989_s15 = sshll.u32 %s1262_s13, 3  ;;  %s306_s16 = sadd.s32 %s991_s12, %s990_s14  ;;  %v1010_v25 = vld [vmem:[%s1375_s4 + $0x28] sm:$0xff]  ;;  %v627_v26 = vld [vmem:[%s1375_s4] sm:$0xff]  ;;  %vm641_vm12 = vcmask 261120   ;;  %v1018_v53 = vld [vmem:[%s1375_s4 + $0x58] sm:$0xff] }
  0x13   : > { %s299_s19 = scalar_lea.vmem %s1371_s0, %s989_s15  ;;  %s992_s20 = sshll.u32 %s306_s16, 3  ;;  %v1009_v27 = vld [vmem:[%s1375_s4 + $0x20] sm:$0xff]  ;;  %v598_v30 = vadd.s32 8, %v597_v29  ;;  %v1017_v55 = vld [vmem:[%s1375_s4 + $0x50] sm:$0xff]  ;;  %v1016_v56 = vld [vmem:[%s1375_s4 + $0x48] sm:$0xff] }
  0x14   : > { %s308_s30 = scalar_lea.vmem %s1372_s1, %s992_s20  ;;  %v317_v3 = vld [vmem:[%s299_s19] sm:$0xff]  ;;  %s1006_s22 = sshll.u32 %s1159_s21, 3 }
  0x15   : > { %v318_v4 = vld [vmem:[%s308_s30] sm:$0xff]  ;;  %v321_v5 = vrot.slane %v317_v3, 6  ;;  %v319_v6 = vld [vmem:[%s308_s30 + $0x8] sm:$0x3]  ;;  %s1007_s7 = sadd.s32 4294967295, %s1006_s22  ;;  %s316_s30 = scalar_lea.vmem %s1377_s6, %s989_s15 }
  0x16   : > { %v336_v7 = vrot.slane %v319_v6, 1  ;;  %v510_v14 = vrot.slane %v319_v6, 2  ;;  %v601_v32 = vstv %s1007_s7  ;;  %v1008_v40 = vld [vmem:[%s1374_s3] ss:$0 sm:$0xff] }
  0x17   : > { %v324_v8 = vsel %vm323_vm1, %v318_v4, %v321_v5  ;;  %v325_v9 = vsel %vm323_vm1, %v321_v5, %v318_v4  ;;  %v603_v34 = vadd.s32 %v601_v32, %v598_v30  ;;  %v602_v38 = vadd.s32 %v601_v32, %v597_v29  ;;  %v1015_v58 = vld [vmem:[%s1375_s4 + $0x40] sm:$0xff] }
  0x18   : > { %v333_v10 = vrot.slane %v324_v8, 1  ;;  %v334_v11 = vrot.slane %v325_v9, 1  ;;  %1054 = vmatprep.mubr.msk.f32.mxu1 %vm338_vm2, %v324_v8  ;;  %v507_v12 = vrot.slane %v324_v8, 2  ;;  %v508_v13 = vrot.slane %v325_v9, 2  ;;  %v1020_v3 = vld [vmem:[%s1376_s5] ss:$0 sm:$0xff] }
  0x19   : > { %1055 = vmatmul.mubr.msk.f32.vlgmr.msra.gmra.mxu1 %vm338_vm2, %v325_v9  ;;  %vm605_vm6 = vcmp.ge.s32.totalorder %v603_v34, 0  ;;  %vm607_vm7 = vcmp.lt.s32.totalorder %v603_v34, 16  ;;  %vm604_vm8 = vcmp.ge.s32.totalorder %v602_v38, 0  ;;  %vm606_vm9 = vcmp.lt.s32.totalorder %v602_v38, 16 }
  0x1a   : > { %v335_v15 = vsel %vm332_vm3, %v333_v10, %v334_v11  ;;  %v337_v16 = vsel %vm332_vm3, %v334_v11, %v336_v7  ;;  %v509_v17 = vsel %vm506_vm4, %v507_v12, %v508_v13  ;;  %v511_v18 = vsel %vm506_vm4, %v508_v13, %v510_v14  ;;  %1063 = vmatpush3.msra.mxu1 %v1012_v21  ;;  %vm609_vm10 = vmand %vm605_vm6, %vm607_vm7 }
  0x1b   : > { %1049 = vmatprep.mubr.msk.f32.mxu0 %vm338_vm2, %v335_v15  ;;  %1064 = vmatprep.subr.mxu1 %v1177_v19  ;;  %vm608_vm11 = vmand %vm604_vm8, %vm606_vm9 }
  0x1c   : > { %1050 = vmatmul.mubr.msk.f32.vlgmr.msra.gmra.mxu0 %vm338_vm2, %v337_v16  ;;  %1065 = vmatpush3.msra.mxu1 %v1011_v23 }
  0x1d   : > { %1058 = vmatpush3.msk.msra.mxu0 %vm343_vm0, %v1002_v2  ;;  %1059 = vmatprep.mubr.msk.f32.mxu0 %vm338_vm2, %v509_v17 }
  0x1e   : > { %1073 = vmatprep.subr.mxu0 %v1177_v19  ;;  %1066 = vmatprep.subr.mxu1 %v1177_v19 }
  0x1f   : > { %1067 = vmatpush3.msra.mxu1 %v1010_v25  ;;  %1070 = vmatprep.mubr.msk.f32.mxu1 %vm1178_vm5, %v1177_v19 }
  0x20   : > { %1060 = vmatmul.mubr.msk.f32.vlgmr.msra.gmra.mxu0 %vm338_vm2, %v511_v18  ;;  %1068 = vmatprep.subr.mxu1 %v1177_v19 }
  0x21   : > { %1074 = vmatpush3.msra.mxu0 %v630_v20  ;;  %1081 = vmatprep.mubr.msk.f32.mxu0 %vm1178_vm5, %v1177_v19 }
  0x22   : > { %1075 = vmatprep.subr.mxu0 %v1177_v19  ;;  %1069 = vmatpush3.msra.mxu1 %v1009_v27 }
  0x23   : > { %1076 = vmatpush3.msra.mxu0 %v629_v22  ;;  %1084 = vmatprep.subr.mxu1 %v1177_v19 }
  0x24   : > { %1077 = vmatprep.subr.mxu0 %v1177_v19 }
  0x25   : > { %1078 = vmatpush3.msra.mxu0 %v628_v24 }
  0x26   : > { %1079 = vmatprep.subr.mxu0 %v1177_v19 }
  0x27   : > { %1080 = vmatpush3.msra.mxu0 %v627_v26 }
  0xd9   : > { %v1056_v31 = vpop.f32.mrf.mxu1 }
  0xdb   : > { %v495_v36 = vpop.f32.mrf.mxu1 }
  0xdc   : > { %v1051_v33 = vpop.f32.mrf.mxu0 }
  0xdd   : > { %v501_v37 = vadd.f32 %v1056_v31, %v1051_v33 }
  0xde   : > { %v413_v35 = vpop.f32.mrf.mxu0 }
  0xdf   : > { %v496_v41 = vadd.f32 %v495_v36, %v413_v35 }
  0xe0   : > { %v1061_v39 = vpop.f32.mrf.mxu0 }
  0xe1   : > { %v595_v42 = vadd.f32 %v1061_v39, %v501_v37 }
  0xe2   : > { %v585_v43 = vpop.f32.mrf.mxu0 }
  0xe3   : > { %v618_v44 = vadd.f32 %v1008_v40, %v595_v42  ;;  %v594_v45 = vadd.f32 %v585_v43, %v496_v41 }
  0xe5   : > { %v620_v46 = vmax.f32 %v618_v44, 0.0  ;;  %v617_v47 = vadd.f32 %v1008_v40, %v594_v45 }
  0xe7   : > { %v626_v48 = vsel %vm609_vm10, %v620_v46, 0.0  ;;  %v619_v49 = vmax.f32 %v617_v47, 0.0 }
  0xe8   : > { %v639_v51 = vrot.slane %v626_v48, 1  ;;  %v792_v59 = vrot.slane %v626_v48, 2 }
  0xe9   : > { %v625_v50 = vsel %vm608_vm11, %v619_v49, 0.0 }
  0xea   : > { %v638_v52 = vrot.slane %v625_v50, 1  ;;  %1082 = vmatmul.mubr.msk.f32.vlgmr.msra.gmra.mxu0 %vm641_vm12, %v625_v50  ;;  %v791_v57 = vrot.slane %v625_v50, 2 }
  0xec   : > { %v640_v54 = vsel %vm332_vm3, %v638_v52, %v639_v51  ;;  %v793_v60 = vsel %vm506_vm4, %v791_v57, %v792_v59 }
  0xed   : > { %1071 = vmatmul.mubr.msk.f32.vlgmr.msra.gmra.mxu1 %vm641_vm12, %v640_v54 }
  0xee   : > { %1085 = vmatpush3.msra.mxu1 %v1018_v53  ;;  %1092 = vmatprep.mubr.msk.f32.mxu1 %vm1178_vm5, %v1177_v19 }
  0xef   : > { %1086 = vmatprep.subr.mxu1 %v1177_v19 }
  0xf0   : > { %1087 = vmatpush3.msra.mxu1 %v1017_v55 }
  0xf1   : > { %1088 = vmatprep.subr.mxu1 %v1177_v19 }
  0xf2   : > { %1089 = vmatpush3.msra.mxu1 %v1016_v56 }
  0xf3   : > { %1090 = vmatprep.subr.mxu1 %v1177_v19 }
  0xf4   : > { %1091 = vmatpush3.msra.mxu1 %v1015_v58 }
  0xf5   : > { %1093 = vmatmul.mubr.msk.f32.vlgmr.msra.gmra.mxu1 %vm641_vm12, %v793_v60 }
 0x1aa   : > { %v782_v61 = vpop.f32.mrf.mxu0 }
 0x1ac   : > { %v1083_v62 = vpop.f32.mrf.mxu0 }
 0x1ad   : > { %v710_v63 = vpop.f32.mrf.mxu1 }
 0x1ae   : > { %v783_v1 = vadd.f32 %v782_v61, %v710_v63 }
 0x1af   : > { %v1072_v0 = vpop.f32.mrf.mxu1 }
 0x1b5   : > { %v862_v2 = vpop.f32.mrf.mxu1 }
 0x1b6   : > { %v866_v4 = vadd.f32 %v862_v2, %v783_v1 }
 0x1b7   : > { %v1094_v5 = vpop.f32.mrf.mxu1 }
 0x1b8   : > { %v874_v6 = vadd.f32 %v1020_v3, %v866_v4 }
 0x1ba   : > { %875 = vst.msk [vmem:[%s316_s30] sm:$0xff] %vm338_vm2, %v874_v6 }
 0x1bb PF: > { %s16_s25 = sadd.s32 1, %s1175_s25   ;;  %s1378_s21 = smov %s1167_s23 }
 0x1bc   : > { %p13_p7 = scmp.ge.s32.totalorder %s16_s25, 6   ;;  %s1379_s22 = smov %s1171_s24 }
 0x1bd   : > { %s1380_s23 = smov %s1383_s26  ;;  %s1381_s24 = smov %s1387_s27 }
 0x1be   :  { %15 = sbr.rel (!%p13_p7) target bundleno = 3 (0x3), region = 81 }

</bundles_post_ra>
